<compile_context>
chip_gen: v5e
topology: v5e:2x2
jax: 0.10.0
libtpu: 0.0.40
codegen_flags: <defaults>
</compile_context>

<pallas_src>
import jax
import jax.numpy as jnp
from jax.experimental import pallas as pl
from jax.experimental.pallas import tpu as pltpu

EPS = 1e-5


def _bn_relu(h, gamma, beta, out_dtype=jnp.float32):
    """Training-mode BatchNorm1d (biased variance) + ReLU in one reduction pass.

    Shared by the kernel and the numerics-matched reference so they line up exactly.
    `out_dtype` lets the caller fold the bf16 downcast for the following matmul into
    this epilogue (avoids an extra full pass over the (B, H) intermediate).
    """
    inv_b = 1.0 / h.shape[0]
    s1 = jnp.sum(h, axis=0, keepdims=True)
    s2 = jnp.sum(h * h, axis=0, keepdims=True)
    mu = s1 * inv_b
    var = jnp.maximum(s2 * inv_b - mu * mu, 0.0)   # E[x^2]-E[x]^2, clamped, f32
    # TODO(synk): at very large B switch to centered / Welford-style stats (the
    #             fused formula loses low bits when B >> 1e5).
    h = (h - mu) * jax.lax.rsqrt(var + EPS) * gamma + beta
    return jnp.maximum(h, 0.0).astype(out_dtype)


def critic_kernel(x_ref, w1_ref, w2_ref, vec_ref, o_ref):
    x = x_ref[...]                      # (B, D) f32
    vec = vec_ref[...]                  # (8, H) f32 packed per-feature vectors
    g1, be1 = vec[0:1, :], vec[1:2, :]
    g2, be2 = vec[2:3, :], vec[3:4, :]
    w3_row = vec[4:5, :]                # output-layer weight as a row (f32, VPU path)
    b3 = vec[5:6, 0:1]                  # output-layer bias (scalar, broadcast)

    # ---- layer 1: Linear (bias cancelled by BN) + BatchNorm1d + ReLU ----
    # Kept in f32: D is small so the MXU cost is negligible and precision vs. the
    # exact PyTorch forward improves markedly.
    h = jnp.dot(x, w1_ref[...], preferred_element_type=jnp.float32)
    h = _bn_relu(h, g1, be1, out_dtype=jnp.bfloat16)   # bf16 feeds the next matmul

    # ---- layer 2: Linear (bias cancelled by BN) + BatchNorm1d + ReLU ----
    h = jnp.dot(h, w2_ref[...], preferred_element_type=jnp.float32)
    h = _bn_relu(h, g2, be2)                           # stays f32 for the head

    # ---- output: Linear(hidden, 1) + Tanh on VPU/XLU (N=1 would waste the MXU) ----
    out = jnp.sum(h * w3_row, axis=1, keepdims=True) + b3
    o_ref[...] = jnp.tanh(out).astype(o_ref.dtype)


def _padded_bytes(rows, cols, dtype):
    """Bytes of one VMEM tile after (sublane, 128)-lane padding."""
    itemsize = jnp.dtype(dtype).itemsize
    sublane = 8 * (4 // itemsize)            # f32 -> 8, bf16 -> 16 (sublane packing)
    r = -(-rows // sublane) * sublane
    c = -(-cols // 128) * 128
    return r * c * itemsize


def _vmem_budget_bytes(B, D, H):
    need = (
        _padded_bytes(B, D, jnp.float32)       # x
        + _padded_bytes(D, H, jnp.float32)     # w1
        + _padded_bytes(H, H, jnp.bfloat16)    # w2
        + _padded_bytes(8, H, jnp.float32)     # packed vec
        + _padded_bytes(B, 1, jnp.float32)     # out
        + 2 * _padded_bytes(B, H, jnp.float32)  # f32 intermediates
        + _padded_bytes(B, H, jnp.bfloat16)     # bf16 h feeding matmul 2
    )
    # 2x headroom for compiler scratch / spills, clamped to the v7x physical ceiling.
    return int(min(64 << 20, max(4 << 20, 2 * need)))


def critic_forward(x, w1, w2_bf16, vec):
    B, D = x.shape
    H = w1.shape[1]

    vmem_spec = pl.BlockSpec(memory_space=pltpu.MemorySpace.VMEM)

    return pl.pallas_call(
        critic_kernel,
        out_shape=jax.ShapeDtypeStruct((B, 1), jnp.float32),
        in_specs=[vmem_spec, vmem_spec, vmem_spec, vmem_spec],
        out_specs=vmem_spec,
        compiler_params=pltpu.CompilerParams(
            vmem_limit_bytes=_vmem_budget_bytes(B, D, H)),
    )(x, w1, w2_bf16, vec)


def init_params(key, input_dim, hidden_dim):
    """PyTorch-style init: Linear weights/bias ~ U(-1/sqrt(fan_in), 1/sqrt(fan_in)),
    BatchNorm gamma=1, beta=0. b1/b2 are kept here only for the exact reference."""
    ks = jax.random.split(key, 6)

    def linear(kw, kb, fan_in, fan_out):
        bound = 1.0 / jnp.sqrt(fan_in)
        w = jax.random.uniform(kw, (fan_in, fan_out), jnp.float32, -bound, bound)
        b = jax.random.uniform(kb, (1, fan_out), jnp.float32, -bound, bound)
        return w, b

    w1, b1 = linear(ks[0], ks[1], input_dim, hidden_dim)
    w2, b2 = linear(ks[2], ks[3], hidden_dim, hidden_dim)
    w3, b3 = linear(ks[4], ks[5], hidden_dim, 1)
    g1 = jnp.ones((1, hidden_dim), jnp.float32)
    be1 = jnp.zeros((1, hidden_dim), jnp.float32)
    g2 = jnp.ones((1, hidden_dim), jnp.float32)
    be2 = jnp.zeros((1, hidden_dim), jnp.float32)
    return (w1, b1, g1, be1, w2, b2, g2, be2, w3, b3)


def prepare_params(params):
    """Kernel-side layout: f32 w1 (small), bf16 w2 (dominant), one packed (8, H)
    f32 per-feature block (g1, be1, g2, be2, w3-row, b3)."""
    (w1, b1, g1, be1, w2, b2, g2, be2, w3, b3) = params
    H = w1.shape[1]
    vec = jnp.zeros((8, H), jnp.float32)
    vec = vec.at[0].set(g1.reshape(-1))
    vec = vec.at[1].set(be1.reshape(-1))
    vec = vec.at[2].set(g2.reshape(-1))
    vec = vec.at[3].set(be2.reshape(-1))
    vec = vec.at[4].set(w3.reshape(-1))
    vec = vec.at[5].set(jnp.full((H,), b3.reshape(())[()], jnp.float32))
    return w1, w2.astype(jnp.bfloat16), vec


def reference_matched(x, w1, w2_bf16, vec):
    """Pure-JAX reference mirroring the kernel's numerics exactly."""
    g1, be1 = vec[0:1, :], vec[1:2, :]
    g2, be2 = vec[2:3, :], vec[3:4, :]
    w3_row = vec[4:5, :]
    b3 = vec[5:6, 0:1]
    h = jnp.dot(x, w1, preferred_element_type=jnp.float32)
    h = _bn_relu(h, g1, be1, out_dtype=jnp.bfloat16)
    h = jnp.dot(h, w2_bf16, preferred_element_type=jnp.float32)
    h = _bn_relu(h, g2, be2)
    return jnp.tanh(jnp.sum(h * w3_row, axis=1, keepdims=True) + b3)


def reference_exact(x, params):
    """Full-precision PyTorch-semantics reference (with b1/b2, centered variance)."""
    (w1, b1, g1, be1, w2, b2, g2, be2, w3, b3) = params

    def bn(h, g, be):
        mu = jnp.mean(h, axis=0, keepdims=True)
        var = jnp.mean((h - mu) ** 2, axis=0, keepdims=True)
        return (h - mu) / jnp.sqrt(var + EPS) * g + be

    h = jnp.maximum(bn(x @ w1 + b1, g1, be1), 0.0)
    h = jnp.maximum(bn(h @ w2 + b2, g2, be2), 0.0)
    return jnp.tanh(h @ w3 + b3)


if __name__ == "__main__":
    key = jax.random.PRNGKey(0)
    k_x, k_p = jax.random.split(key)

    batch, input_dim, hidden_dim = 8, 16, 32
    x = jax.random.normal(k_x, (batch, input_dim), jnp.float32)
    params = init_params(k_p, input_dim, hidden_dim)
    w1, w2_bf16, vec = prepare_params(params)

    out = critic_forward(x, w1, w2_bf16, vec)
    out = jax.block_until_ready(out)

    ref_m = reference_matched(x, w1, w2_bf16, vec)
    ref_e = reference_exact(x, params)

    assert out.shape == (batch, 1), out.shape
    # strict check against the numerics-matched reference (same bf16 path, fused var)
    assert jnp.allclose(out, ref_m, atol=2e-3, rtol=2e-3), (out, ref_m)
    # check against the exact f32 PyTorch-semantics reference; residual difference is
    # only bf16 rounding on the second (H x H) matmul, so the tolerance tightens
    # vs. the previous all-bf16 version.
    assert jnp.allclose(out, ref_e, atol=0.1), (out, ref_e)

    print("KERNEL_OK")
</pallas_src>

<mosaic_0001>
module attributes {stable_mosaic.version = 11 : i64} {
  func.func @critic_kernel(%arg0: memref<8x16xf32, #tpu.memory_space<vmem>>, %arg1: memref<16x32xf32, #tpu.memory_space<vmem>>, %arg2: memref<32x32xbf16, #tpu.memory_space<vmem>>, %arg3: memref<8x32xf32, #tpu.memory_space<vmem>>, %arg4: memref<8x1xf32, #tpu.memory_space<vmem>>) attributes {dimension_semantics = [], scalar_prefetch = 0 : i64, scratch_operands = 0 : i64, tpu.core_type = #tpu.core_type<tc>} {
    %c0 = arith.constant 0 : index
    %c0_0 = arith.constant 0 : index
    %0 = vector.load %arg0[%c0, %c0_0] : memref<8x16xf32, #tpu.memory_space<vmem>>, vector<8x16xf32>
    %c0_1 = arith.constant 0 : index
    %c0_2 = arith.constant 0 : index
    %1 = vector.load %arg3[%c0_1, %c0_2] : memref<8x32xf32, #tpu.memory_space<vmem>>, vector<8x32xf32>
    %2 = vector.extract_strided_slice %1 {offsets = [0, 0], sizes = [1, 32], strides = [1, 1]} : vector<8x32xf32> to vector<1x32xf32>
    %3 = vector.extract_strided_slice %1 {offsets = [1, 0], sizes = [1, 32], strides = [1, 1]} : vector<8x32xf32> to vector<1x32xf32>
    %4 = vector.extract_strided_slice %1 {offsets = [2, 0], sizes = [1, 32], strides = [1, 1]} : vector<8x32xf32> to vector<1x32xf32>
    %5 = vector.extract_strided_slice %1 {offsets = [3, 0], sizes = [1, 32], strides = [1, 1]} : vector<8x32xf32> to vector<1x32xf32>
    %6 = vector.extract_strided_slice %1 {offsets = [4, 0], sizes = [1, 32], strides = [1, 1]} : vector<8x32xf32> to vector<1x32xf32>
    %7 = vector.extract_strided_slice %1 {offsets = [5, 0], sizes = [1, 1], strides = [1, 1]} : vector<8x32xf32> to vector<1x1xf32>
    %c0_3 = arith.constant 0 : index
    %c0_4 = arith.constant 0 : index
    %8 = vector.load %arg1[%c0_3, %c0_4] : memref<16x32xf32, #tpu.memory_space<vmem>>, vector<16x32xf32>
    %cst = arith.constant dense<0.000000e+00> : vector<8x32xf32>
    %9 = tpu.matmul %0, %8, %cst {dimension_numbers = #tpu.dot_dimension_numbers<[1], [0], [0], [1], [0, 0, 1, 1], [], []>} : vector<8x16xf32>, vector<16x32xf32>, vector<8x32xf32> -> vector<8x32xf32>
    %cst_5 = arith.constant dense<0.000000e+00> : vector<32xf32>
    %10 = vector.multi_reduction <add>, %9, %cst_5 [0] : vector<8x32xf32> to vector<32xf32>
    %11 = vector.shape_cast %10 : vector<32xf32> to vector<1x32xf32>
    %12 = arith.mulf %9, %9 : vector<8x32xf32>
    %cst_6 = arith.constant dense<0.000000e+00> : vector<32xf32>
    %13 = vector.multi_reduction <add>, %12, %cst_6 [0] : vector<8x32xf32> to vector<32xf32>
    %14 = vector.shape_cast %13 : vector<32xf32> to vector<1x32xf32>
    %cst_7 = arith.constant 1.250000e-01 : f32
    %15 = vector.broadcast %cst_7 : f32 to vector<1x32xf32>
    %16 = arith.mulf %11, %15 : vector<1x32xf32>
    %cst_8 = arith.constant 1.250000e-01 : f32
    %17 = vector.broadcast %cst_8 : f32 to vector<1x32xf32>
    %18 = arith.mulf %14, %17 : vector<1x32xf32>
    %19 = arith.mulf %16, %16 : vector<1x32xf32>
    %20 = arith.subf %18, %19 : vector<1x32xf32>
    %cst_9 = arith.constant 0.000000e+00 : f32
    %21 = vector.broadcast %cst_9 : f32 to vector<1x32xf32>
    %22 = arith.maximumf %20, %21 : vector<1x32xf32>
    %23 = vector.broadcast %16 : vector<1x32xf32> to vector<8x32xf32>
    %24 = arith.subf %9, %23 : vector<8x32xf32>
    %cst_10 = arith.constant 9.99999974E-6 : f32
    %25 = vector.broadcast %cst_10 : f32 to vector<1x32xf32>
    %26 = arith.addf %22, %25 : vector<1x32xf32>
    %27 = math.rsqrt %26 : vector<1x32xf32>
    %28 = vector.broadcast %27 : vector<1x32xf32> to vector<8x32xf32>
    %29 = arith.mulf %24, %28 : vector<8x32xf32>
    %30 = vector.broadcast %2 : vector<1x32xf32> to vector<8x32xf32>
    %31 = arith.mulf %29, %30 : vector<8x32xf32>
    %32 = vector.broadcast %3 : vector<1x32xf32> to vector<8x32xf32>
    %33 = arith.addf %31, %32 : vector<8x32xf32>
    %cst_11 = arith.constant 0.000000e+00 : f32
    %34 = vector.broadcast %cst_11 : f32 to vector<8x32xf32>
    %35 = arith.maximumf %33, %34 : vector<8x32xf32>
    %36 = arith.truncf %35 : vector<8x32xf32> to vector<8x32xbf16>
    %c0_12 = arith.constant 0 : index
    %c0_13 = arith.constant 0 : index
    %37 = vector.load %arg2[%c0_12, %c0_13] : memref<32x32xbf16, #tpu.memory_space<vmem>>, vector<32x32xbf16>
    %cst_14 = arith.constant dense<0.000000e+00> : vector<8x32xf32>
    %38 = tpu.matmul %36, %37, %cst_14 {dimension_numbers = #tpu.dot_dimension_numbers<[1], [0], [0], [1], [0, 0, 1, 1], [], []>} : vector<8x32xbf16>, vector<32x32xbf16>, vector<8x32xf32> -> vector<8x32xf32>
    %cst_15 = arith.constant dense<0.000000e+00> : vector<32xf32>
    %39 = vector.multi_reduction <add>, %38, %cst_15 [0] : vector<8x32xf32> to vector<32xf32>
    %40 = vector.shape_cast %39 : vector<32xf32> to vector<1x32xf32>
    %41 = arith.mulf %38, %38 : vector<8x32xf32>
    %cst_16 = arith.constant dense<0.000000e+00> : vector<32xf32>
    %42 = vector.multi_reduction <add>, %41, %cst_16 [0] : vector<8x32xf32> to vector<32xf32>
    %43 = vector.shape_cast %42 : vector<32xf32> to vector<1x32xf32>
    %cst_17 = arith.constant 1.250000e-01 : f32
    %44 = vector.broadcast %cst_17 : f32 to vector<1x32xf32>
    %45 = arith.mulf %40, %44 : vector<1x32xf32>
    %cst_18 = arith.constant 1.250000e-01 : f32
    %46 = vector.broadcast %cst_18 : f32 to vector<1x32xf32>
    %47 = arith.mulf %43, %46 : vector<1x32xf32>
    %48 = arith.mulf %45, %45 : vector<1x32xf32>
    %49 = arith.subf %47, %48 : vector<1x32xf32>
    %cst_19 = arith.constant 0.000000e+00 : f32
    %50 = vector.broadcast %cst_19 : f32 to vector<1x32xf32>
    %51 = arith.maximumf %49, %50 : vector<1x32xf32>
    %52 = vector.broadcast %45 : vector<1x32xf32> to vector<8x32xf32>
    %53 = arith.subf %38, %52 : vector<8x32xf32>
    %cst_20 = arith.constant 9.99999974E-6 : f32
    %54 = vector.broadcast %cst_20 : f32 to vector<1x32xf32>
    %55 = arith.addf %51, %54 : vector<1x32xf32>
    %56 = math.rsqrt %55 : vector<1x32xf32>
    %57 = vector.broadcast %56 : vector<1x32xf32> to vector<8x32xf32>
    %58 = arith.mulf %53, %57 : vector<8x32xf32>
    %59 = vector.broadcast %4 : vector<1x32xf32> to vector<8x32xf32>
    %60 = arith.mulf %58, %59 : vector<8x32xf32>
    %61 = vector.broadcast %5 : vector<1x32xf32> to vector<8x32xf32>
    %62 = arith.addf %60, %61 : vector<8x32xf32>
    %cst_21 = arith.constant 0.000000e+00 : f32
    %63 = vector.broadcast %cst_21 : f32 to vector<8x32xf32>
    %64 = arith.maximumf %62, %63 : vector<8x32xf32>
    %65 = vector.broadcast %6 : vector<1x32xf32> to vector<8x32xf32>
    %66 = arith.mulf %64, %65 : vector<8x32xf32>
    %cst_22 = arith.constant dense<0.000000e+00> : vector<8xf32>
    %67 = vector.multi_reduction <add>, %66, %cst_22 [1] : vector<8x32xf32> to vector<8xf32>
    %68 = vector.shape_cast %67 : vector<8xf32> to vector<8x1xf32>
    %69 = vector.broadcast %7 : vector<1x1xf32> to vector<8x1xf32>
    %70 = arith.addf %68, %69 : vector<8x1xf32>
    %71 = math.tanh %70 : vector<8x1xf32>
    %c0_23 = arith.constant 0 : index
    %c0_24 = arith.constant 0 : index
    %72 = vector.load %arg4[%c0_23, %c0_24] : memref<8x1xf32, #tpu.memory_space<vmem>>, vector<8x1xf32>
    tpu.vector_store %arg4[%c0_23, %c0_24], %71 {strides = array<i32>} : memref<8x1xf32, #tpu.memory_space<vmem>>, vector<8x1xf32>,
    return
  }
}

</mosaic_0001>

<bundles_post_ra>
// kernel: tpu_custom_call.1
= control target key start
LH: loop header
LB: loop body
LE: loop exit
PB: predicated region body
PF: predicated region fallthrough
CT: control target
= control target key end

     0   :  { %9 = vsyncpa [#allocation3], 0  ;;  %s422_s0 = inlined_call_operand.hbm [shape: f32[8,16], index: 0, kind: input, shape index: {}]   ;;  %s423_s1 = inlined_call_operand.hbm [shape: f32[16,32], index: 1, kind: input, shape index: {}]   ;;  %s424_s2 = inlined_call_operand.hbm [shape: bf16[32,32], index: 2, kind: input, shape index: {}]   ;;  %s425_s3 = inlined_call_operand.hbm [shape: f32[8,32], index: 3, kind: input, shape index: {}]   ;;  %s426_s4 = inlined_call_operand.vmem [shape: f32[8,1], index: 4, kind: output, shape index: {}]  }
   0x1   :  { %10 = vsyncpa [#allocation5], 0  ;;  %s27_s17 = sshll.u32 %s423_s1, 4  ;;  %s28_s17 = int_to_ptr.hbm [resolvable:$true] %s27_s17 }
   0x2   :  { %11 = vsyncpa [#allocation8], 0  ;;  %s360_s18 = smov [#allocation4]   ;;  %s17_s22 = sshll.u32 %s422_s0, 4  ;;  %s18_s22 = int_to_ptr.hbm [resolvable:$true] %s17_s22 }
   0x3   :  { %s29_s19 = sshll.u32 %s360_s18, 4  ;;  %s361_s23 = smov 128   ;;  %s30_s19 = int_to_ptr.vmem [resolvable:$true] %s29_s19 }
   0x4   :  { %s362_s24 = smov 8   ;;  %s363_s25 = smov [#allocation2]  }
   0x5   :  { %35 = dma.hbm_to_vmem [thread:$0]  %s28_s17, 256, %s30_s19, [#allocation5], %s361_s23, %s361_s23, %s362_s24  }
   0x6   :  { %s19_s26 = sshll.u32 %s363_s25, 4  ;;  %s40_s29 = sshll.u32 %s424_s2, 4  ;;  %s20_s26 = int_to_ptr.vmem [resolvable:$true] %s19_s26  ;;  %s41_s29 = int_to_ptr.hbm [resolvable:$true] %s40_s29 }
   0x7   :  { %22 = dma.hbm_to_vmem [thread:$0]  %s18_s22, 128, %s20_s26, [#allocation3]  }
   0x8   :  { %s364_s1 = smov [#allocation6]   ;;  %s54_s0 = sshll.u32 %s425_s3, 4  ;;  %s55_s0 = int_to_ptr.hbm [resolvable:$true] %s54_s0 }
   0x9   :  { %s42_s30 = sshll.u32 %s364_s1, 4  ;;  %s365_s7 = smov 64   ;;  %s43_s30 = int_to_ptr.vmem [resolvable:$true] %s42_s30 }
   0xa   :  { %s366_s8 = smov 4   ;;  %s367_s9 = smov [#allocation7]  }
   0xb   :  { %48 = dma.hbm_to_vmem [thread:$0]  %s41_s29, 256, %s43_s30, [#allocation5], %s365_s7, %s365_s7, %s366_s8  }
   0xc   :  { %s56_s10 = sshll.u32 %s367_s9, 4  ;;  %s57_s10 = int_to_ptr.vmem [resolvable:$true] %s56_s10 }
   0xd   :  { %59 = dma.hbm_to_vmem [thread:$0]  %s55_s0, 128, %s57_s10, [#allocation8]  }
   0xe   :  { %354 = dma.done.wait [#allocation3], 128  }
   0xf   :  { %355 = vsyncadd [#allocation3], 4294967168 }
  0x10   :  { %356 = dma.done.wait [#allocation5], 512  }
  0x11   :  { %357 = vsyncadd [#allocation5], 4294966784 }
  0x12   :  { %358 = dma.done.wait [#allocation8], 128  }
  0x13   :  { %359 = vsyncadd [#allocation8], 4294967168  ;;  %v80_v0 = vld [vmem:[#allocation4 + $0x8] sm:$0xff]  ;;  %v79_v1 = vld [vmem:[#allocation4] sm:$0xff]  ;;  %vm81_vm0 = vcmask 130048   ;;  %vm105_vm1 = vcmask 261120  }
  0x14   :  { %99 = vmatpush.msra.mxu0 %v80_v0  ;;  %v77_v2 = vld [vmem:[#allocation2] sm:$0xff]  ;;  %v242_v19 = vld [vmem:[#allocation6] sm:$0xff]  ;;  %v407_v31 = vld [vmem:[#allocation7] sm:$0xff]  ;;  %vm223_vm8 = vcmask 7168  }
  0x15   :  { %v243_v16 = vld [vmem:[#allocation6 + $0x8] sm:$0xff]  ;;  %v139_v35 = vperm.slane %v407_v31, 0  ;;  %v141_v38 = vperm.slane %v407_v31, 1 }
  0x16   :  { %100 = vmatpush.msra.mxu0 %v79_v1  ;;  %170 = vmatpush.bf16.msra.mxu1 %v243_v16 }
  0x17   :  { %232 = vmatmul.msk.f32.vlgmr.msra.gmra.mxu0 %vm81_vm0, %v77_v2 }
  0x1a   :  { %171 = vmatpush.bf16.msra.mxu1 %v242_v19  ;;  %v220_v19 = vperm.slane %v407_v31, 5 }
  0x94   :  { %v102_v3 = vpop.f32.mrf.mxu0 }
  0x95   :  { %v106_v4 = vsel %vm105_vm1, %v102_v3, 0.0  ;;  %v113_v5 = vmul.f32 %v102_v3, %v102_v3 }
  0x96   :  { %v107_v6 = vrot.slane %v106_v4, 4 }
  0x97   :  { %v114_v7 = vsel %vm105_vm1, %v113_v5, 0.0 }
  0x98   :  { %v108_v8 = vadd.f32 %v107_v6, %v106_v4  ;;  %v115_v9 = vrot.slane %v114_v7, 4 }
  0x9a   :  { %v109_v10 = vrot.slane %v108_v8, 2  ;;  %v116_v11 = vadd.f32 %v115_v9, %v114_v7  ;;  %v210_v9 = vperm.slane %v407_v31, 2 }
  0x9c   :  { %v110_v12 = vadd.f32 %v109_v10, %v108_v8  ;;  %v117_v13 = vrot.slane %v116_v11, 2 }
  0x9e   :  { %v111_v14 = vrot.slane %v110_v12, 1  ;;  %v118_v15 = vadd.f32 %v117_v13, %v116_v11 }
  0xa0   :  { %v112_v17 = vadd.f32 %v111_v14, %v110_v12  ;;  %v119_v18 = vrot.slane %v118_v15, 1  ;;  %v212_v12 = vperm.slane %v407_v31, 3 }
  0xa2   :  { %v120_v20 = vadd.f32 %v119_v18, %v118_v15  ;;  %v121_v21 = vmul.f32 0.125, %v112_v17  ;;  %v215_v15 = vperm.slane %v407_v31, 4 }
  0xa4   :  { %v122_v22 = vmul.f32 0.125, %v120_v20  ;;  %v123_v23 = vmul.f32 %v121_v21, %v121_v21  ;;  %v126_v34 = vsub.f32 %v102_v3, %v121_v21 }
  0xa6   :  { %v124_v24 = vsub.f32 %v122_v22, %v123_v23 }
  0xa8   :  { %v125_v25 = vmax.f32 %v124_v24, 0.0 }
  0xaa   :  { %v127_v26 = vadd.f32 1e-05, %v125_v25 }
  0xac   :  { %252 = vrsqrt.f32 %v127_v26  ;;  %vm134_vm3 = vweird.f32 %v127_v26 }
  0xb2   :  { %v253_v27 = vpop.eup %252 }
  0xb3   :  { %v129_v28 = vmul.f32 %v253_v27, %v127_v26  ;;  %vm135_vm2 = vweird.f32 %v253_v27 }
  0xb4   :  { %vm136_vm4 = vmor %vm134_vm3, %vm135_vm2 }
  0xb5   :  { %v130_v29 = vmul.f32 %v253_v27, %v129_v28 }
  0xb7   :  { %v131_v30 = vmul.f32 0.5, %v130_v29 }
  0xb9   :  { %v132_v32 = vsub.f32 1.5, %v131_v30 }
  0xbb   :  { %v133_v33 = vmul.f32 %v253_v27, %v132_v32 }
  0xbd   :  { %v137_v36 = vsel %vm136_vm4, %v253_v27, %v133_v33 }
  0xbe   :  { %v138_v37 = vmul.f32 %v137_v36, %v126_v34 }
  0xc0   :  { %v140_v39 = vmul.f32 %v139_v35, %v138_v37 }
  0xc2   :  { %v142_v40 = vadd.f32 %v141_v38, %v140_v39 }
  0xc4   :  { %v143_v41 = vmax.f32 %v142_v40, 0.0 }
  0xc6   :  { %v144_v42 = vpack.c.bf16 %v143_v41, %v143_v41 }
  0xc8   :  { %241 = vmatmul.msk.bf16.vlgmr.msra.gmra.mxu1 %vm105_vm1, %v144_v42 }
 0x145   :  { %v173_v43 = vpop.f32.mrf.mxu1 }
 0x146   :  { %v177_v44 = vsel %vm105_vm1, %v173_v43, 0.0  ;;  %v184_v45 = vmul.f32 %v173_v43, %v173_v43 }
 0x147   :  { %v178_v46 = vrot.slane %v177_v44, 4 }
 0x148   :  { %v185_v47 = vsel %vm105_vm1, %v184_v45, 0.0 }
 0x149   :  { %v179_v48 = vadd.f32 %v178_v46, %v177_v44  ;;  %v186_v49 = vrot.slane %v185_v47, 4 }
 0x14b   :  { %v180_v50 = vrot.slane %v179_v48, 2  ;;  %v187_v51 = vadd.f32 %v186_v49, %v185_v47 }
 0x14d   :  { %v181_v52 = vadd.f32 %v180_v50, %v179_v48  ;;  %v188_v53 = vrot.slane %v187_v51, 2  ;;  %v175_v54 = vpop.f32.mrf.mxu1 }
 0x14f   :  { %v182_v55 = vrot.slane %v181_v52, 1  ;;  %v189_v56 = vadd.f32 %v188_v53, %v187_v51 }
 0x151   :  { %v183_v57 = vadd.f32 %v182_v55, %v181_v52  ;;  %v190_v58 = vrot.slane %v189_v56, 1 }
 0x153   :  { %v191_v59 = vadd.f32 %v190_v58, %v189_v56  ;;  %v192_v60 = vmul.f32 0.125, %v183_v57 }
 0x155   :  { %v193_v61 = vmul.f32 0.125, %v191_v59  ;;  %v194_v62 = vmul.f32 %v192_v60, %v192_v60  ;;  %v197_v8 = vsub.f32 %v173_v43, %v192_v60 }
 0x157   :  { %v195_v63 = vsub.f32 %v193_v61, %v194_v62 }
 0x159   :  { %v196_v0 = vmax.f32 %v195_v63, 0.0 }
 0x15b   :  { %v198_v1 = vadd.f32 1e-05, %v196_v0 }
 0x15d   :  { %254 = vrsqrt.f32 %v198_v1  ;;  %vm205_vm6 = vweird.f32 %v198_v1 }
 0x163   :  { %v255_v2 = vpop.eup %254 }
 0x164   :  { %v200_v3 = vmul.f32 %v255_v2, %v198_v1  ;;  %vm206_vm5 = vweird.f32 %v255_v2 }
 0x165   :  { %vm207_vm7 = vmor %vm205_vm6, %vm206_vm5 }
 0x166   :  { %v201_v4 = vmul.f32 %v255_v2, %v200_v3 }
 0x168   :  { %v202_v5 = vmul.f32 0.5, %v201_v4 }
 0x16a   :  { %v203_v6 = vsub.f32 1.5, %v202_v5 }
 0x16c   :  { %v204_v7 = vmul.f32 %v255_v2, %v203_v6 }
 0x16e   :  { %v208_v10 = vsel %vm207_vm7, %v255_v2, %v204_v7 }
 0x16f   :  { %v209_v11 = vmul.f32 %v208_v10, %v197_v8 }
 0x171   :  { %v211_v13 = vmul.f32 %v210_v9, %v209_v11 }
 0x173   :  { %v213_v14 = vadd.f32 %v212_v12, %v211_v13 }
 0x175   :  { %v214_v16 = vmax.f32 %v213_v14, 0.0 }
 0x177   :  { %v216_v17 = vmul.f32 %v215_v15, %v214_v16 }
 0x179   :  { %v217_v18 = vsel %vm105_vm1, %v216_v17, 0.0 }
 0x17a   :  { %218 = vadd.xlane.f32.xlu0 %v217_v18 }
 0x1ed   :  { %v219_v20 = vpop.xlane.xlu0 %218 }
 0x1ee   :  { %v221_v21 = vadd.f32 %v220_v19, %v219_v20 }
 0x1f0   :  { %256 = vtanh.f32 %v221_v21 }
 0x1f6   :  { %v257_v22 = vpop.eup %256 }
 0x1f7   :  { %224 = vst.msk [vmem:[%s426_s4] sm:$0xff] %vm223_vm8, %v257_v22 }
 0x1f8   :  { %229 = vsyncpa [#allocation3], 1 }
 0x1f9   :  { %230 = vsyncpa [#allocation5], 1 }
 0x1fa   :  { %231 = vsyncpa [#allocation8], 1 }

</bundles_post_ra>
